<compile_context>
chip_gen: v6e
topology: v6e:2x2x1
jax: 0.10.0
libtpu: 0.0.40
codegen_flags: <defaults>
</compile_context>

<pallas_src>
import functools

import jax
import jax.numpy as jnp
from jax.experimental import pallas as pl
from jax.experimental.pallas import tpu as pltpu

LN_EPS = 1e-5  # PyTorch nn.LayerNorm default


def _round_up(x, m):
    return ((x + m - 1) // m) * m


def _patch_pos_kernel(patches_ref, w_ref, gamma_ref, beta_ref, pos_ref, out_ref,
                      *, e_true):
    # patches_ref: (TM, K) bf16   w_ref: (K, Ep) bf16
    # gamma/beta : (1, Ep) f32    pos_ref: (TM, Ep) bf16   out_ref: (TM, Ep) f32
    x = jnp.dot(patches_ref[...], w_ref[...],
                preferred_element_type=jnp.float32)           # (TM, Ep) f32

    # LayerNorm over the true E lanes (padded weight columns are zero, so x is
    # exactly zero there and the plain sums over the padded lane dim are exact).
    inv_e = jnp.float32(1.0 / e_true)
    s1 = jnp.sum(x, axis=-1, keepdims=True)
    s2 = jnp.sum(x * x, axis=-1, keepdims=True)
    mean = s1 * inv_e
    var = jnp.maximum(s2 * inv_e - mean * mean, 0.0)           # biased variance
    inv = jax.lax.rsqrt(var + LN_EPS)

    # gamma/beta/pos are zero in padded lanes -> padded outputs stay zero.
    y = (x - mean) * inv * gamma_ref[...] + beta_ref[...]
    y = y + pos_ref[...].astype(jnp.float32)
    out_ref[...] = y.astype(out_ref.dtype)


@functools.partial(jax.jit, static_argnames=("patch_size", "row_tile"))
def patch_pos_embed(image, conv_w, gamma, beta, position, *, patch_size,
                    row_tile=256):
    """image: (B, C, H, W) NCHW. conv_w: (E, C, ps, ps). position: (1, P, E)."""
    B, C, H, W = image.shape
    E = conv_w.shape[0]
    ps = patch_size
    Hp, Wp = H // ps, W // ps
    N = Hp * Wp
    K = C * ps * ps
    R = B * N

    # ---- host-side glue (pure data movement) --------------------------------
    # Non-overlapping patch extraction -> (B*N, K), K flattened in (C, kh, kw)
    # order so the strided Conv2d is an exact matmul against the Conv2d weight.
    patches = image.reshape(B, C, Hp, ps, Wp, ps)
    patches = patches.transpose(0, 2, 4, 1, 3, 5).reshape(R, K)

    # bf16 operands (mem-bound kernel); MXU accumulates in f32.
    patches = patches.astype(jnp.bfloat16)
    w_mat = conv_w.reshape(E, K).T.astype(jnp.bfloat16)               # (K, E)
    pos = jnp.tile(position[0, :N, :], (B, 1)).astype(jnp.bfloat16)   # (R, E)

    # Lane-dense E and row tiling.
    Ep = _round_up(E, 128)
    TM = row_tile if R >= row_tile else _round_up(R, 8)
    Rp = _round_up(R, TM)

    patches = jnp.pad(patches, ((0, Rp - R), (0, 0)))
    pos = jnp.pad(pos, ((0, Rp - R), (0, Ep - E)))
    w_mat = jnp.pad(w_mat, ((0, 0), (0, Ep - E)))
    gamma2 = jnp.pad(gamma.astype(jnp.float32).reshape(1, E), ((0, 0), (0, Ep - E)))
    beta2 = jnp.pad(beta.astype(jnp.float32).reshape(1, E), ((0, 0), (0, Ep - E)))

    cost = pl.CostEstimate(
        flops=2 * Rp * K * Ep,
        transcendentals=0,
        bytes_accessed=Rp * K * 2 + K * Ep * 2 + Rp * Ep * 2 + Rp * Ep * 4,
    )

    out = pl.pallas_call(
        functools.partial(_patch_pos_kernel, e_true=E),
        out_shape=jax.ShapeDtypeStruct((Rp, Ep), jnp.float32),
        grid=(Rp // TM,),
        in_specs=[
            pl.BlockSpec((TM, K), lambda i: (i, 0)),
            pl.BlockSpec((K, Ep), lambda i: (0, 0)),   # weight: VMEM-resident
            pl.BlockSpec((1, Ep), lambda i: (0, 0)),
            pl.BlockSpec((1, Ep), lambda i: (0, 0)),
            pl.BlockSpec((TM, Ep), lambda i: (i, 0)),
        ],
        out_specs=pl.BlockSpec((TM, Ep), lambda i: (i, 0)),
        compiler_params=pltpu.CompilerParams(dimension_semantics=("parallel",)),
        cost_estimate=cost,
    )(patches, w_mat, gamma2, beta2, pos)

    out = out[:R, :E].reshape(B, N, E)
    return out, Hp  # mirrors (x, self.patch_len) since patch_len == H/ps


if __name__ == "__main__":
    # Small shapes consistent with the module:
    # dim=32, patch_len=2, pos_num=1, channels=3, patch_size=16, batch=2
    dim = 32
    patch_len = 2
    pos_num = 1
    channels = 3
    patch_size = 16
    B = 2
    H = W = patch_len * patch_size  # 32 -> N = 4 patches

    key = jax.random.PRNGKey(0)
    k1, k2, k3 = jax.random.split(key, 3)

    image = jax.random.normal(k1, (B, channels, H, W), dtype=jnp.float32)
    conv_w = jax.random.normal(
        k2, (dim, channels, patch_size, patch_size), dtype=jnp.float32) * 0.02
    position = jax.random.normal(
        k3, (1, patch_len ** 2 + pos_num, dim), dtype=jnp.float32)
    gamma = jnp.ones((dim,), dtype=jnp.float32)   # LayerNorm weight init
    beta = jnp.zeros((dim,), dtype=jnp.float32)   # LayerNorm bias init

    out, plen = patch_pos_embed(image, conv_w, gamma, beta, position,
                                patch_size=patch_size)
    jax.block_until_ready(out)

    # Pure-JAX reference with the same bf16 input quantization as the kernel
    # (kernel runs bf16 operands with f32 accumulation).
    Hp = H // patch_size
    N = Hp * Hp
    patches = image.reshape(B, channels, Hp, patch_size, Hp, patch_size)
    patches = patches.transpose(0, 2, 4, 1, 3, 5).reshape(B, N, -1)
    p_q = patches.astype(jnp.bfloat16).astype(jnp.float32)
    w_q = conv_w.reshape(dim, -1).T.astype(jnp.bfloat16).astype(jnp.float32)
    pos_q = position[:, :N, :].astype(jnp.bfloat16).astype(jnp.float32)
    ref = jnp.einsum("bnk,ke->bne", p_q, w_q)
    mu = ref.mean(-1, keepdims=True)
    var = ((ref - mu) ** 2).mean(-1, keepdims=True)
    ref = (ref - mu) / jnp.sqrt(var + LN_EPS) * gamma + beta
    ref = ref + pos_q

    assert out.shape == (B, N, dim)
    assert int(plen) == patch_len
    assert jnp.allclose(out, ref, atol=1e-3, rtol=1e-3), "mismatch vs reference"

    print("KERNEL_OK")
</pallas_src>

<mosaic_0001>
module attributes {stable_mosaic.version = 11 : i64} {
  func.func @_patch_pos_kernel(%arg0: i32, %arg1: memref<8x768xbf16, #tpu.memory_space<vmem>>, %arg2: memref<768x128xbf16, #tpu.memory_space<vmem>>, %arg3: memref<1x128xf32, #tpu.memory_space<vmem>>, %arg4: memref<1x128xf32, #tpu.memory_space<vmem>>, %arg5: memref<8x128xbf16, #tpu.memory_space<vmem>>, %arg6: memref<8x128xf32, #tpu.memory_space<vmem>>) attributes {dimension_semantics = [#tpu.dimension_semantics<parallel>], iteration_bounds = array<i64: 1>, scalar_prefetch = 0 : i64, scratch_operands = 0 : i64, tpu.core_type = #tpu.core_type<tc>, window_params = [{transform_indices = @transform_0, window_bounds = array<i64: 8, 768>}, {pipeline_mode = #tpu.pipeline_mode<synchronous>, transform_indices = @transform_1, window_bounds = array<i64: 768, 128>}, {pipeline_mode = #tpu.pipeline_mode<synchronous>, transform_indices = @transform_2, window_bounds = array<i64: 1, 128>}, {pipeline_mode = #tpu.pipeline_mode<synchronous>, transform_indices = @transform_3, window_bounds = array<i64: 1, 128>}, {transform_indices = @transform_4, window_bounds = array<i64: 8, 128>}, {transform_indices = @transform_5, window_bounds = array<i64: 8, 128>}]} {
    %c0 = arith.constant 0 : index
    %c0_0 = arith.constant 0 : index
    %0 = vector.load %arg1[%c0, %c0_0] : memref<8x768xbf16, #tpu.memory_space<vmem>>, vector<8x768xbf16>
    %c0_1 = arith.constant 0 : index
    %c0_2 = arith.constant 0 : index
    %1 = vector.load %arg2[%c0_1, %c0_2] : memref<768x128xbf16, #tpu.memory_space<vmem>>, vector<768x128xbf16>
    %cst = arith.constant dense<0.000000e+00> : vector<8x128xf32>
    %2 = tpu.matmul %0, %1, %cst {dimension_numbers = #tpu.dot_dimension_numbers<[1], [0], [0], [1], [0, 0, 1, 1], [], []>} : vector<8x768xbf16>, vector<768x128xbf16>, vector<8x128xf32> -> vector<8x128xf32>
    %cst_3 = arith.constant dense<0.000000e+00> : vector<8xf32>
    %3 = vector.multi_reduction <add>, %2, %cst_3 [1] : vector<8x128xf32> to vector<8xf32>
    %4 = vector.shape_cast %3 : vector<8xf32> to vector<8x1xf32>
    %5 = arith.mulf %2, %2 : vector<8x128xf32>
    %cst_4 = arith.constant dense<0.000000e+00> : vector<8xf32>
    %6 = vector.multi_reduction <add>, %5, %cst_4 [1] : vector<8x128xf32> to vector<8xf32>
    %7 = vector.shape_cast %6 : vector<8xf32> to vector<8x1xf32>
    %cst_5 = arith.constant 3.125000e-02 : f32
    %8 = vector.broadcast %cst_5 : f32 to vector<8x1xf32>
    %9 = arith.mulf %4, %8 : vector<8x1xf32>
    %cst_6 = arith.constant 3.125000e-02 : f32
    %10 = vector.broadcast %cst_6 : f32 to vector<8x1xf32>
    %11 = arith.mulf %7, %10 : vector<8x1xf32>
    %12 = arith.mulf %9, %9 : vector<8x1xf32>
    %13 = arith.subf %11, %12 : vector<8x1xf32>
    %cst_7 = arith.constant 0.000000e+00 : f32
    %14 = vector.broadcast %cst_7 : f32 to vector<8x1xf32>
    %15 = arith.maximumf %13, %14 : vector<8x1xf32>
    %cst_8 = arith.constant 9.99999974E-6 : f32
    %16 = vector.broadcast %cst_8 : f32 to vector<8x1xf32>
    %17 = arith.addf %15, %16 : vector<8x1xf32>
    %18 = math.rsqrt %17 : vector<8x1xf32>
    %19 = vector.broadcast %9 : vector<8x1xf32> to vector<8x128xf32>
    %20 = arith.subf %2, %19 : vector<8x128xf32>
    %21 = vector.broadcast %18 : vector<8x1xf32> to vector<8x128xf32>
    %22 = arith.mulf %20, %21 : vector<8x128xf32>
    %c0_9 = arith.constant 0 : index
    %c0_10 = arith.constant 0 : index
    %23 = vector.load %arg3[%c0_9, %c0_10] : memref<1x128xf32, #tpu.memory_space<vmem>>, vector<1x128xf32>
    %24 = vector.broadcast %23 : vector<1x128xf32> to vector<8x128xf32>
    %25 = arith.mulf %22, %24 : vector<8x128xf32>
    %c0_11 = arith.constant 0 : index
    %c0_12 = arith.constant 0 : index
    %26 = vector.load %arg4[%c0_11, %c0_12] : memref<1x128xf32, #tpu.memory_space<vmem>>, vector<1x128xf32>
    %27 = vector.broadcast %26 : vector<1x128xf32> to vector<8x128xf32>
    %28 = arith.addf %25, %27 : vector<8x128xf32>
    %c0_13 = arith.constant 0 : index
    %c0_14 = arith.constant 0 : index
    %29 = vector.load %arg5[%c0_13, %c0_14] : memref<8x128xbf16, #tpu.memory_space<vmem>>, vector<8x128xbf16>
    %30 = arith.extf %29 : vector<8x128xbf16> to vector<8x128xf32>
    %31 = arith.addf %28, %30 : vector<8x128xf32>
    %c0_15 = arith.constant 0 : index
    %c0_16 = arith.constant 0 : index
    %32 = vector.load %arg6[%c0_15, %c0_16] : memref<8x128xf32, #tpu.memory_space<vmem>>, vector<8x128xf32>
    tpu.vector_store %arg6[%c0_15, %c0_16], %31 {strides = array<i32>} : memref<8x128xf32, #tpu.memory_space<vmem>>, vector<8x128xf32>,
    return
  }
  func.func @transform_0(%arg0: i32) -> (i32, i32) {
    %c0_i32 = arith.constant 0 : i32
    %c0_i32_0 = arith.constant 0 : i32
    return %arg0, %c0_i32 : i32, i32
  }
  func.func @transform_1(%arg0: i32) -> (i32, i32) {
    %c0_i32 = arith.constant 0 : i32
    %c0_i32_0 = arith.constant 0 : i32
    %c0_i32_1 = arith.constant 0 : i32
    return %c0_i32, %c0_i32_0 : i32, i32
  }
  func.func @transform_2(%arg0: i32) -> (i32, i32) {
    %c0_i32 = arith.constant 0 : i32
    %c0_i32_0 = arith.constant 0 : i32
    %c0_i32_1 = arith.constant 0 : i32
    return %c0_i32, %c0_i32_0 : i32, i32
  }
  func.func @transform_3(%arg0: i32) -> (i32, i32) {
    %c0_i32 = arith.constant 0 : i32
    %c0_i32_0 = arith.constant 0 : i32
    %c0_i32_1 = arith.constant 0 : i32
    return %c0_i32, %c0_i32_0 : i32, i32
  }
  func.func @transform_4(%arg0: i32) -> (i32, i32) {
    %c0_i32 = arith.constant 0 : i32
    %c0_i32_0 = arith.constant 0 : i32
    return %arg0, %c0_i32 : i32, i32
  }
  func.func @transform_5(%arg0: i32) -> (i32, i32) {
    %c0_i32 = arith.constant 0 : i32
    %c0_i32_0 = arith.constant 0 : i32
    return %arg0, %c0_i32 : i32, i32
  }
}

</mosaic_0001>

<bundles_post_ra>
// kernel: patch_pos_embed.1
= control target key start
LH: loop header
LB: loop body
LE: loop exit
PB: predicated region body
PF: predicated region fallthrough
CT: control target
= control target key end

     0   :  { %s995_s0 = inlined_call_operand.vmem [shape: bf16[8,768], index: 0, kind: input, shape index: {}]   ;;  %s996_s1 = inlined_call_operand.vmem [shape: bf16[768,128], index: 1, kind: input, shape index: {}]   ;;  %s997_s2 = inlined_call_operand.vmem [shape: f32[1,128], index: 2, kind: input, shape index: {}]   ;;  %s998_s3 = inlined_call_operand.vmem [shape: f32[1,128], index: 3, kind: input, shape index: {}]   ;;  %s999_s4 = inlined_call_operand.vmem [shape: bf16[8,128], index: 4, kind: input, shape index: {}]   ;;  %s1000_s5 = inlined_call_operand.hbm [shape: f32[8,128], index: 5, kind: output, shape index: {}]  }
   0x1   :  { %v721_v0 = vld [vmem:[%s996_s1 + $0x78] sm:$0xff]   ;;  %v725_v4 = vld [vmem:[%s996_s1 + $0x70] sm:$0xff]   ;;  %v729_v8 = vld [vmem:[%s996_s1 + $0x68] sm:$0xff]  }
   0x2   :  { %v722_v1 = vld [vmem:[%s996_s1 + $0xf8] sm:$0xff]   ;;  %654 = vmatprep.subr.bf16.mxu0 %v721_v0  ;;  %v726_v5 = vld [vmem:[%s996_s1 + $0xf0] sm:$0xff]   ;;  %v730_v9 = vld [vmem:[%s996_s1 + $0xe8] sm:$0xff]  }
   0x3   :  { %v723_v2 = vld [vmem:[%s996_s1 + $0x38] sm:$0xff]   ;;  %676 = vmatprep.subr.bf16.mxu1 %v722_v1  ;;  %v727_v6 = vld [vmem:[%s996_s1 + $0x30] sm:$0xff]   ;;  %v731_v10 = vld [vmem:[%s996_s1 + $0x28] sm:$0xff]  }
   0x4   :  { %v724_v3 = vld [vmem:[%s996_s1 + $0xb8] sm:$0xff]   ;;  %655 = vmatpush3.bf16.msra.mxu0 %v723_v2  ;;  %v728_v7 = vld [vmem:[%s996_s1 + $0xb0] sm:$0xff]   ;;  %v732_v11 = vld [vmem:[%s996_s1 + $0xa8] sm:$0xff]  }
   0x5   :  { %677 = vmatpush3.bf16.msra.mxu1 %v724_v3  ;;  %656 = vmatprep.subr.bf16.mxu0 %v725_v4  ;;  %v733_v12 = vld [vmem:[%s996_s1 + $0x60] sm:$0xff]   ;;  %v737_v16 = vld [vmem:[%s996_s1 + $0x58] sm:$0xff]   ;;  %v741_v20 = vld [vmem:[%s996_s1 + $0x50] sm:$0xff]  }
   0x6   :  { %678 = vmatprep.subr.bf16.mxu1 %v726_v5  ;;  %v734_v13 = vld [vmem:[%s996_s1 + $0xe0] sm:$0xff]   ;;  %v738_v17 = vld [vmem:[%s996_s1 + $0xd8] sm:$0xff]   ;;  %v742_v21 = vld [vmem:[%s996_s1 + $0xd0] sm:$0xff]  }
   0x7   :  { %v735_v14 = vld [vmem:[%s996_s1 + $0x20] sm:$0xff]   ;;  %v739_v18 = vld [vmem:[%s996_s1 + $0x18] sm:$0xff]   ;;  %v743_v22 = vld [vmem:[%s996_s1 + $0x10] sm:$0xff]  }
   0x8   :  { %657 = vmatpush3.bf16.msra.mxu0 %v727_v6  ;;  %v736_v15 = vld [vmem:[%s996_s1 + $0xa0] sm:$0xff]   ;;  %v740_v19 = vld [vmem:[%s996_s1 + $0x98] sm:$0xff]   ;;  %v744_v23 = vld [vmem:[%s996_s1 + $0x90] sm:$0xff]  }
   0x9   :  { %679 = vmatpush3.bf16.msra.mxu1 %v728_v7  ;;  %658 = vmatprep.subr.bf16.mxu0 %v729_v8  ;;  %v745_v24 = vld [vmem:[%s996_s1 + $0x48] sm:$0xff]   ;;  %v749_v28 = vld [vmem:[%s996_s1 + $0x40] sm:$0xff]   ;;  %v757_v38 = vld [vmem:[%s996_s1 + $0x178] sm:$0xff]  }
   0xa   :  { %680 = vmatprep.subr.bf16.mxu1 %v730_v9  ;;  %v746_v25 = vld [vmem:[%s996_s1 + $0xc8] sm:$0xff]   ;;  %v750_v29 = vld [vmem:[%s996_s1 + $0xc0] sm:$0xff]   ;;  %v758_v39 = vld [vmem:[%s996_s1 + $0x138] sm:$0xff]  }
   0xb   :  { %v747_v26 = vld [vmem:[%s996_s1 + $0x8] sm:$0xff]   ;;  %v751_v30 = vld [vmem:[%s996_s1] sm:$0xff]   ;;  %v759_v40 = vld [vmem:[%s996_s1 + $0x170] sm:$0xff]  }
   0xc   :  { %659 = vmatpush3.bf16.msra.mxu0 %v731_v10  ;;  %v748_v27 = vld [vmem:[%s996_s1 + $0x88] sm:$0xff]   ;;  %v752_v31 = vld [vmem:[%s996_s1 + $0x80] sm:$0xff]   ;;  %v760_v41 = vld [vmem:[%s996_s1 + $0x130] sm:$0xff]  }
   0xd   :  { %681 = vmatpush3.bf16.msra.mxu1 %v732_v11  ;;  %660 = vmatprep.subr.bf16.mxu0 %v733_v12  ;;  %v22_v32 = vld [vmem:[%s995_s0] sm:$0xff]  ;;  %v23_v33 = vld [vmem:[%s995_s0 + $0x8] sm:$0xff]  ;;  %v765_v46 = vld [vmem:[%s996_s1 + $0x158] sm:$0xff]  }
   0xe   :  { %682 = vmatprep.subr.bf16.mxu1 %v734_v13  ;;  %v598_v34 = vcombine.low %v22_v32, %v22_v32  ;;  %v599_v35 = vcombine.high %v22_v32, %v22_v32  ;;  %v600_v36 = vcombine.low %v23_v33, %v23_v33  ;;  %v601_v37 = vcombine.high %v23_v33, %v23_v33  ;;  %v761_v42 = vld [vmem:[%s996_s1 + $0x168] sm:$0xff]   ;;  %v763_v44 = vld [vmem:[%s996_s1 + $0x160] sm:$0xff]   ;;  %v24_v47 = vld [vmem:[%s995_s0 + $0x10] sm:$0xff] }
   0xf   :  { %v762_v43 = vld [vmem:[%s996_s1 + $0x128] sm:$0xff]   ;;  %v764_v45 = vld [vmem:[%s996_s1 + $0x120] sm:$0xff]   ;;  %v603_v48 = vcombine.high %v24_v47, %v24_v47 }
  0x10   :  { %661 = vmatpush3.bf16.msra.mxu0 %v735_v14  ;;  %462 = vmatprep.mubr.bf16.mxu0 %v599_v35 }
  0x11   :  { %683 = vmatpush3.bf16.msra.mxu1 %v736_v15  ;;  %662 = vmatprep.subr.bf16.mxu0 %v737_v16 }
  0x12   :  { %684 = vmatprep.subr.bf16.mxu1 %v738_v17  ;;  %502 = vmatprep.mubr.bf16.mxu1 %v601_v37 }
  0x14   :  { %663 = vmatpush3.bf16.msra.mxu0 %v739_v18 }
  0x15   :  { %685 = vmatpush3.bf16.msra.mxu1 %v740_v19  ;;  %664 = vmatprep.subr.bf16.mxu0 %v741_v20 }
  0x16   :  { %686 = vmatprep.subr.bf16.mxu1 %v742_v21 }
  0x18   :  { %665 = vmatpush3.bf16.msra.mxu0 %v743_v22 }
  0x19   :  { %687 = vmatpush3.bf16.msra.mxu1 %v744_v23  ;;  %666 = vmatprep.subr.bf16.mxu0 %v745_v24 }
  0x1a   :  { %688 = vmatprep.subr.bf16.mxu1 %v746_v25 }
  0x1c   :  { %667 = vmatpush3.bf16.msra.mxu0 %v747_v26 }
  0x1d   :  { %689 = vmatpush3.bf16.msra.mxu1 %v748_v27  ;;  %668 = vmatprep.subr.bf16.mxu0 %v749_v28 }
  0x1e   :  { %690 = vmatprep.subr.bf16.mxu1 %v750_v29 }
  0x20   :  { %669 = vmatpush3.bf16.msra.mxu0 %v751_v30 }
  0x21   :  { %691 = vmatpush3.bf16.msra.mxu1 %v752_v31  ;;  %698 = vmatprep.subr.bf16.mxu0 %v757_v38 }
  0x23   :  { %463 = vmatmul.mubr.bf16.vlgmr.msra.gmra.mxu0 %v598_v34 }
  0x24   :  { %503 = vmatmul.mubr.bf16.vlgmr.msra.gmra.mxu1 %v600_v36  ;;  %699 = vmatpush3.bf16.msra.mxu0 %v758_v39 }
  0x25   :  { %700 = vmatprep.subr.bf16.mxu0 %v759_v40 }
  0x28   :  { %701 = vmatpush3.bf16.msra.mxu0 %v760_v41 }
  0x29   :  { %702 = vmatprep.subr.bf16.mxu0 %v761_v42 }
  0x2c   :  { %703 = vmatpush3.bf16.msra.mxu0 %v762_v43 }
  0x2d   :  { %704 = vmatprep.subr.bf16.mxu0 %v763_v44 }
  0x2e   :  { %10 = vsyncpa [#allocation3], 0  ;;  %v766_v49 = vld [vmem:[%s996_s1 + $0x118] sm:$0xff]   ;;  %v767_v50 = vld [vmem:[%s996_s1 + $0x150] sm:$0xff]   ;;  %542 = vmatprep.mubr.bf16.mxu0 %v603_v48  ;;  %v602_v56 = vcombine.low %v24_v47, %v24_v47  ;;  %s799_s24 = smov [#allocation2]  }
  0x2f   :  { %v768_v51 = vld [vmem:[%s996_s1 + $0x110] sm:$0xff]   ;;  %v769_v52 = vld [vmem:[%s996_s1 + $0x148] sm:$0xff]   ;;  %v771_v54 = vld [vmem:[%s996_s1 + $0x140] sm:$0xff]   ;;  %s590_s25 = sshll.u32 %s799_s24, 4  ;;  %s591_s25 = int_to_ptr.vmem [resolvable:$true] %s590_s25 }
  0x30   :  { %705 = vmatpush3.bf16.msra.mxu0 %v764_v45  ;;  %v770_v53 = vld [vmem:[%s996_s1 + $0x108] sm:$0xff]   ;;  %v772_v55 = vld [vmem:[%s996_s1 + $0x100] sm:$0xff]   ;;  %s777_s26 = scalar_lea.vmem %s591_s25, 128  ;;  %p782_p1 = scmp.lt.s32.totalorder %s591_s25, %s591_s25 }
  0x31   :  { %706 = vmatprep.subr.bf16.mxu0 %v765_v46  ;;  %v652_v21 = vld [vmem:[%s997_s2] ss:$0 sm:$0xff]  ;;  %p778_p0 = scmp.ne.s32.totalorder %s591_s25, %s777_s26  ;;  %p783_p2 = scmp.lt.s32.totalorder %s777_s26, %s777_s26 }
  0x32   :  { %v580_v22 = vld [vmem:[%s999_s4] sm:$0xf] }
  0x33   :  { %v653_v24 = vld [vmem:[%s998_s3] ss:$0 sm:$0xff]  ;;  %v581_v26 = vunpack.c.l.bf16 %v580_v22  ;;  %p784_p3 = por %p783_p2, %p782_p1 }
  0x34   :  { %707 = vmatpush3.bf16.msra.mxu0 %v766_v49 }
  0x35   :  { %708 = vmatprep.subr.bf16.mxu0 %v767_v50  ;;  %p785_p4 = pnand %p784_p3, %p778_p0 }
  0x38   :  { %709 = vmatpush3.bf16.msra.mxu0 %v768_v51 }
  0x39   :  { %710 = vmatprep.subr.bf16.mxu0 %v769_v52 }
  0x3c   :  { %711 = vmatpush3.bf16.msra.mxu0 %v770_v53 }
  0x3d   :  { %712 = vmatprep.subr.bf16.mxu0 %v771_v54 }
  0x40   :  { %713 = vmatpush3.bf16.msra.mxu0 %v772_v55 }
  0x43   :  { %543 = vmatmul.mubr.bf16.vlgmr.msra.gmra.mxu0 %v602_v56 }
  0xe3   :  { %v670_v57 = vpop.f32.mrf.mxu0 }
  0xe4   :  { %v692_v58 = vpop.f32.mrf.mxu1 }
  0xe5   :  { %v671_v59 = vpop.f32.mrf.mxu0 }
  0xe6   :  { %v693_v60 = vpop.f32.mrf.mxu1  ;;  %v672_v1 = vadd.f32 %v671_v59, %v670_v57 }
  0xe7   :  { %v673_v61 = vpop.f32.mrf.mxu0  ;;  %v694_v2 = vadd.f32 %v693_v60, %v692_v58 }
  0xe8   :  { %v695_v62 = vpop.f32.mrf.mxu1 }
  0xe9   :  { %v674_v63 = vpop.f32.mrf.mxu0  ;;  %v505_v5 = vadd.f32 %v694_v2, %v672_v1 }
  0xea   :  { %v696_v0 = vpop.f32.mrf.mxu1 }
 0x103   :  { %v714_v3 = vpop.f32.mrf.mxu0 }
 0x105   :  { %v715_v4 = vpop.f32.mrf.mxu0 }
 0x106   :  { %v716_v6 = vadd.f32 %v715_v4, %v714_v3 }
 0x107   :  { %v717_v7 = vpop.f32.mrf.mxu0 }
 0x108   :  { %v545_v8 = vadd.f32 %v716_v6, %v505_v5 }
 0x109   :  { %v718_v9 = vpop.f32.mrf.mxu0 }
 0x10a   :  { %550 = vadd.xlane.f32.xlu0 %v545_v8  ;;  %v552_v10 = vmul.f32 %v545_v8, %v545_v8 }
 0x10e   :  { %553 = vadd.xlane.f32.xlu0 %v552_v10 }
 0x193   :  { %v551_v11 = vpop.xlane.xlu0 %550 }
 0x194   :  { %v555_v12 = vmul.f32 0.03125, %v551_v11 }
 0x196   :  { %v557_v14 = vmul.f32 %v555_v12, %v555_v12  ;;  %v562_v19 = vsub.f32 %v545_v8, %v555_v12 }
 0x197   :  { %v554_v13 = vpop.xlane.xlu0 %553 }
 0x198   :  { %v556_v15 = vmul.f32 0.03125, %v554_v13 }
 0x19a   :  { %v558_v16 = vsub.f32 %v556_v15, %v557_v14 }
 0x19c   :  { %v559_v17 = vmax.f32 %v558_v16, 0.0 }
 0x19e   :  { %v560_v18 = vadd.f32 1e-05, %v559_v17 }
 0x1a0   :  { %775 = vrsqrt.f32 %v560_v18 }
 0x1ad   :  { %v776_v20 = vpop.eup %775 }
 0x1ae   :  { %v563_v23 = vmul.f32 %v776_v20, %v562_v19 }
 0x1b0   :  { %v571_v25 = vmul.f32 %v652_v21, %v563_v23 }
 0x1b2   :  { %v579_v27 = vadd.f32 %v653_v24, %v571_v25 }
 0x1b4   :  { %v582_v28 = vadd.f32 %v581_v26, %v579_v27 }
 0x1b6   :  { %583 = vst [vmem:[#allocation2] sm:$0xff] %v582_v28 }
 0x1b7   :  { %788 = shalt.err (!%p785_p4)
}
 0x1b8   :  { %593 = dma.vmem_to_hbm [thread:$0]  %s591_s25, 128, %s1000_s5, [#allocation3]  }
 0x1b9   :  { %797 = dma.done.wait [#allocation3], 128  }
 0x1ba   :  { %798 = vsyncadd [#allocation3], 4294967168 }
 0x1bb   :  { %597 = vsyncpa [#allocation3], 1 }

</bundles_post_ra>
